<compile_context>
chip_gen: v7x
topology: tpu7x:2x2x1
jax: 0.10.0
libtpu: 0.0.40
codegen_flags: <defaults>
</compile_context>

<pallas_src>
import jax
import jax.numpy as jnp
from jax import lax
from jax.experimental import pallas as pl
from jax.experimental.pallas import tpu as pltpu


# ---------------------------------------------------------------------------
# Exact GELU: 0.5 * x * (1 + erf(x / sqrt(2)))   (matches torch nn.GELU())
# erf via Abramowitz & Stegun 7.1.26 (float32-exact to ~1.5e-7); relies only
# on exp / mul / add / where, which lower on every TPU generation.
# ---------------------------------------------------------------------------
def _erf_f32(x):
    p = 0.3275911
    a1, a2, a3, a4, a5 = (0.254829592, -0.284496736, 1.421413741,
                          -1.453152027, 1.061405429)
    ax = jnp.abs(x)
    t = 1.0 / (1.0 + p * ax)
    poly = ((((a5 * t + a4) * t + a3) * t + a2) * t + a1) * t
    y = 1.0 - poly * jnp.exp(-(ax * ax))
    return jnp.where(x < 0.0, -y, y)


def _gelu_exact(x):
    return 0.5 * x * (1.0 + _erf_f32(x * 0.7071067811865476))


_NT_DIMS = (((1,), (1,)), ((), ()))   # contract last dim of x with last dim of W


# ---------------------------------------------------------------------------
# Resident-weight kernels: one (bm, bn) output tile per step, full K in one
# dot, weight tile (bn, n_in) kept in VMEM across the inner (row) grid axis.
# ---------------------------------------------------------------------------
def _make_resident_kernel(keep_prob=None):
    if keep_prob is None:
        def kernel(x_ref, w_ref, b_ref, o_ref):
            y = lax.dot_general(x_ref[...], w_ref[...],
                                dimension_numbers=_NT_DIMS,
                                preferred_element_type=jnp.float32)
            y = y + b_ref[...].astype(jnp.float32)
            o_ref[...] = _gelu_exact(y).astype(o_ref.dtype)
        return kernel

    # In-kernel inverted dropout (training mode).  Seeded with the row-block
    # index only (grid axis 1) so every column block sees the same mask for
    # the same rows of x.
    threshold = jnp.uint32(min(int(round(keep_prob * 2.0 ** 32)), 2 ** 32 - 1))
    scale = 1.0 / keep_prob

    def kernel(seed_ref, x_ref, w_ref, b_ref, o_ref):
        pltpu.prng_seed(seed_ref[0], pl.program_id(1))
        bits = pltpu.prng_random_bits(x_ref.shape)
        if bits.dtype != jnp.uint32:
            bits = pltpu.bitcast(bits, jnp.uint32)
        x = x_ref[...]
        x = jnp.where(bits < threshold, x * scale, jnp.zeros_like(x))
        y = lax.dot_general(x, w_ref[...],
                            dimension_numbers=_NT_DIMS,
                            preferred_element_type=jnp.float32)
        y = y + b_ref[...].astype(jnp.float32)
        o_ref[...] = _gelu_exact(y).astype(o_ref.dtype)
    return kernel


# ---------------------------------------------------------------------------
# K-tiled fallback (only for very large n_in where the weight panel cannot
# stay resident): accumulate over the last grid axis in an f32 VMEM scratch;
# partial last-K block masked in-kernel (no HBM padding of x).
# ---------------------------------------------------------------------------
def _make_ktiled_kernel(n_in, bk, needs_k_mask):
    def kernel(x_ref, w_ref, b_ref, o_ref, acc_ref):
        k = pl.program_id(2)

        @pl.when(k == 0)
        def _init():
            acc_ref[...] = jnp.zeros_like(acc_ref)

        x = x_ref[...]
        w = w_ref[...]
        if needs_k_mask:
            rem = n_in - k * bk
            xcol = lax.broadcasted_iota(jnp.int32, x.shape, 1)
            wcol = lax.broadcasted_iota(jnp.int32, w.shape, 1)
            x = jnp.where(xcol < rem, x, jnp.zeros_like(x))
            w = jnp.where(wcol < rem, w, jnp.zeros_like(w))

        acc_ref[...] += lax.dot_general(x, w, dimension_numbers=_NT_DIMS,
                                        preferred_element_type=jnp.float32)

        @pl.when(k == pl.num_programs(2) - 1)
        def _finalize():
            y = acc_ref[...] + b_ref[...].astype(jnp.float32)
            o_ref[...] = _gelu_exact(y).astype(o_ref.dtype)
    return kernel


# ---------------------------------------------------------------------------
# Tile selection: keep the whole tile set (double-buffered) under a budget
# that preserves depth-2 pipelining on v7x (64 MiB physical VMEM per TC).
# ---------------------------------------------------------------------------
_VMEM_BUDGET_BYTES = 24 * 1024 * 1024


def _select_resident_tiles(R, n_in, n_out, itemsize):
    bn = n_out if n_out <= 512 else 512        # 256-multiple for the v6e/v7x MXU
    bm_max = R if R <= 512 else 512            # bm == R avoids any row padding
    for bm in (bm_max, 256, 128, 64, 32, 16, 8):
        if bm > bm_max:
            continue
        # 2x for Pallas double-buffering of x / W / bias / out tiles.
        est = 2 * (bm * n_in + bn * n_in + bm * bn + bn) * itemsize
        if est <= _VMEM_BUDGET_BYTES:
            return bm, bn
    return None, None


# ---------------------------------------------------------------------------
# Python wrapper mirroring MLP.forward
# ---------------------------------------------------------------------------
def mlp_forward(x, weight, bias, *, dropout_rate=0.0, deterministic=True,
                rng_seed=0):
    """Equivalent of MLP.forward.  weight: (n_out, n_in), bias: (n_out,)."""
    orig_lead = x.shape[:-1]
    n_in = x.shape[-1]
    n_out = weight.shape[0]

    x2 = x.reshape(-1, n_in)
    R = x2.shape[0]
    b2 = bias.reshape(1, n_out)
    itemsize = jnp.dtype(x.dtype).itemsize

    apply_dropout = (dropout_rate > 0.0) and (not deterministic)

    cost = pl.CostEstimate(
        flops=2 * R * n_in * n_out + 10 * R * n_out,
        transcendentals=R * n_out,
        bytes_accessed=(R * n_in + n_in * n_out + n_out + R * n_out) * itemsize,
    )

    bm, bn = _select_resident_tiles(R, n_in, n_out, itemsize)

    if bm is not None:
        # ---- Resident-weight path (common case) --------------------------
        # Grid order (j, i): the weight block depends only on j, so it is
        # DMA'd once per column block and reused for every row block.
        grid = (pl.cdiv(n_out, bn), pl.cdiv(R, bm))
        in_specs = [
            pl.BlockSpec((bm, n_in), lambda j, i, *_: (i, 0)),   # x rows
            pl.BlockSpec((bn, n_in), lambda j, i, *_: (j, 0)),   # W, (n_out,n_in) layout
            pl.BlockSpec((1, bn),    lambda j, i, *_: (0, j)),   # bias
        ]
        out_spec = pl.BlockSpec((bm, bn), lambda j, i, *_: (i, j))

        if apply_dropout:
            kernel = _make_resident_kernel(keep_prob=1.0 - dropout_rate)
            nsp = 1
            args = (jnp.asarray([rng_seed], dtype=jnp.int32), x2, weight, b2)
        else:
            kernel = _make_resident_kernel(None)
            nsp = 0
            args = (x2, weight, b2)

        out = pl.pallas_call(
            kernel,
            out_shape=jax.ShapeDtypeStruct((R, n_out), x.dtype),
            grid_spec=pltpu.PrefetchScalarGridSpec(
                num_scalar_prefetch=nsp,
                grid=grid,
                in_specs=in_specs,
                out_specs=out_spec,
            ),
            compiler_params=pltpu.CompilerParams(
                dimension_semantics=("parallel", "parallel"),
                vmem_limit_bytes=32 * 1024 * 1024,
            ),
            cost_estimate=cost,
        )(*args)
    else:
        # ---- K-tiled fallback (very large n_in) ---------------------------
        if apply_dropout:
            # Rare path: plain-JAX dropout glue before the kernel.
            key = jax.random.PRNGKey(rng_seed)
            keep = jax.random.bernoulli(key, 1.0 - dropout_rate, x2.shape)
            x2 = jnp.where(keep, x2 / (1.0 - dropout_rate), jnp.zeros_like(x2))

        bm = R if R <= 512 else 512
        bn = n_out if n_out <= 512 else 512
        bk = 512
        kernel = _make_ktiled_kernel(n_in, bk, needs_k_mask=(n_in % bk != 0))
        grid = (pl.cdiv(R, bm), pl.cdiv(n_out, bn), pl.cdiv(n_in, bk))

        out = pl.pallas_call(
            kernel,
            out_shape=jax.ShapeDtypeStruct((R, n_out), x.dtype),
            grid_spec=pltpu.PrefetchScalarGridSpec(
                num_scalar_prefetch=0,
                grid=grid,
                in_specs=[
                    pl.BlockSpec((bm, bk), lambda i, j, k: (i, k)),
                    pl.BlockSpec((bn, bk), lambda i, j, k: (j, k)),
                    pl.BlockSpec((1, bn),  lambda i, j, k: (0, j)),
                ],
                out_specs=pl.BlockSpec((bm, bn), lambda i, j, k: (i, j)),
                scratch_shapes=[pltpu.VMEM((bm, bn), jnp.float32)],
            ),
            compiler_params=pltpu.CompilerParams(
                dimension_semantics=("parallel", "parallel", "arbitrary"),
                vmem_limit_bytes=32 * 1024 * 1024,
            ),
            cost_estimate=cost,
        )(x2, weight, b2)

    return out.reshape(*orig_lead, n_out)


# ---------------------------------------------------------------------------
# Pure-JAX reference (torch forward with dropout=0 / eval mode)
# ---------------------------------------------------------------------------
def _ref_mlp(x, weight, bias):
    return jax.nn.gelu(x @ weight.T + bias, approximate=False)


if __name__ == "__main__":
    key = jax.random.PRNGKey(0)
    kx, kw, kb = jax.random.split(key, 3)

    # small shapes: batch=2, seq=8, n_in=32, n_out=64
    B, S, N_IN, N_OUT = 2, 8, 32, 64
    x = jax.random.normal(kx, (B, S, N_IN), dtype=jnp.float32)
    weight = jax.random.normal(kw, (N_OUT, N_IN), dtype=jnp.float32) * 0.1
    bias = jax.random.normal(kb, (N_OUT,), dtype=jnp.float32) * 0.1

    out = mlp_forward(x, weight, bias)          # dropout=0 (module default)
    jax.block_until_ready(out)

    ref = _ref_mlp(x, weight, bias)
    assert out.shape == (B, S, N_OUT)
    err = float(jnp.max(jnp.abs(out - ref)))
    assert err < 1e-4, err

    print("KERNEL_OK")
</pallas_src>

<mosaic_0001>
module attributes {stable_mosaic.version = 11 : i64} {
  func.func @kernel(%arg0: i32, %arg1: i32, %arg2: memref<16x32xf32, #tpu.memory_space<vmem>>, %arg3: memref<64x32xf32, #tpu.memory_space<vmem>>, %arg4: memref<1x64xf32, #tpu.memory_space<vmem>>, %arg5: memref<16x64xf32, #tpu.memory_space<vmem>>) attributes {dimension_semantics = [#tpu.dimension_semantics<parallel>, #tpu.dimension_semantics<parallel>], iteration_bounds = array<i64: 1, 1>, scalar_prefetch = 0 : i64, scratch_operands = 0 : i64, tpu.core_type = #tpu.core_type<tc>, window_params = [{transform_indices = @transform_0, window_bounds = array<i64: 16, 32>}, {transform_indices = @transform_1, window_bounds = array<i64: 64, 32>}, {transform_indices = @transform_2, window_bounds = array<i64: 1, 64>}, {transform_indices = @transform_3, window_bounds = array<i64: 16, 64>}]} {
    %c0 = arith.constant 0 : index
    %c0_0 = arith.constant 0 : index
    %0 = vector.load %arg2[%c0, %c0_0] : memref<16x32xf32, #tpu.memory_space<vmem>>, vector<16x32xf32>
    %c0_1 = arith.constant 0 : index
    %c0_2 = arith.constant 0 : index
    %1 = vector.load %arg3[%c0_1, %c0_2] : memref<64x32xf32, #tpu.memory_space<vmem>>, vector<64x32xf32>
    %cst = arith.constant dense<0.000000e+00> : vector<16x64xf32>
    %2 = tpu.matmul %0, %1, %cst {dimension_numbers = #tpu.dot_dimension_numbers<[1], [1], [0], [0], [0, 0, 1, 0], [], []>} : vector<16x32xf32>, vector<64x32xf32>, vector<16x64xf32> -> vector<16x64xf32>
    %c0_3 = arith.constant 0 : index
    %c0_4 = arith.constant 0 : index
    %3 = vector.load %arg4[%c0_3, %c0_4] : memref<1x64xf32, #tpu.memory_space<vmem>>, vector<1x64xf32>
    %4 = vector.broadcast %3 : vector<1x64xf32> to vector<16x64xf32>
    %5 = arith.addf %2, %4 : vector<16x64xf32>
    %cst_5 = arith.constant 5.000000e-01 : f32
    %6 = vector.broadcast %cst_5 : f32 to vector<16x64xf32>
    %7 = arith.mulf %6, %5 : vector<16x64xf32>
    %cst_6 = arith.constant 0.707106769 : f32
    %8 = vector.broadcast %cst_6 : f32 to vector<16x64xf32>
    %9 = arith.mulf %5, %8 : vector<16x64xf32>
    %10 = math.absf %9 : vector<16x64xf32>
    %cst_7 = arith.constant 0.327591091 : f32
    %11 = vector.broadcast %cst_7 : f32 to vector<16x64xf32>
    %12 = arith.mulf %11, %10 : vector<16x64xf32>
    %cst_8 = arith.constant 1.000000e+00 : f32
    %13 = vector.broadcast %cst_8 : f32 to vector<16x64xf32>
    %14 = arith.addf %13, %12 : vector<16x64xf32>
    %cst_9 = arith.constant 1.000000e+00 : f32
    %15 = vector.broadcast %cst_9 : f32 to vector<16x64xf32>
    %16 = arith.divf %15, %14 : vector<16x64xf32>
    %cst_10 = arith.constant 1.06140542 : f32
    %17 = vector.broadcast %cst_10 : f32 to vector<16x64xf32>
    %18 = arith.mulf %17, %16 : vector<16x64xf32>
    %cst_11 = arith.constant -1.45315206 : f32
    %19 = vector.broadcast %cst_11 : f32 to vector<16x64xf32>
    %20 = arith.addf %18, %19 : vector<16x64xf32>
    %21 = arith.mulf %20, %16 : vector<16x64xf32>
    %cst_12 = arith.constant 1.42141378 : f32
    %22 = vector.broadcast %cst_12 : f32 to vector<16x64xf32>
    %23 = arith.addf %21, %22 : vector<16x64xf32>
    %24 = arith.mulf %23, %16 : vector<16x64xf32>
    %cst_13 = arith.constant -0.284496725 : f32
    %25 = vector.broadcast %cst_13 : f32 to vector<16x64xf32>
    %26 = arith.addf %24, %25 : vector<16x64xf32>
    %27 = arith.mulf %26, %16 : vector<16x64xf32>
    %cst_14 = arith.constant 0.254829586 : f32
    %28 = vector.broadcast %cst_14 : f32 to vector<16x64xf32>
    %29 = arith.addf %27, %28 : vector<16x64xf32>
    %30 = arith.mulf %29, %16 : vector<16x64xf32>
    %31 = arith.mulf %10, %10 : vector<16x64xf32>
    %cst_15 = arith.constant 0.000000e+00 : f32
    %32 = vector.broadcast %cst_15 : f32 to vector<16x64xf32>
    %33 = arith.subf %32, %31 : vector<16x64xf32>
    %34 = math.exp %33 : vector<16x64xf32>
    %35 = arith.mulf %30, %34 : vector<16x64xf32>
    %cst_16 = arith.constant 1.000000e+00 : f32
    %36 = vector.broadcast %cst_16 : f32 to vector<16x64xf32>
    %37 = arith.subf %36, %35 : vector<16x64xf32>
    %cst_17 = arith.constant 0.000000e+00 : f32
    %38 = vector.broadcast %cst_17 : f32 to vector<16x64xf32>
    %39 = arith.cmpf olt, %9, %38 : vector<16x64xf32>
    %cst_18 = arith.constant 0.000000e+00 : f32
    %40 = vector.broadcast %cst_18 : f32 to vector<16x64xf32>
    %41 = arith.subf %40, %37 : vector<16x64xf32>
    %42 = arith.select %39, %41, %37 : vector<16x64xi1>, vector<16x64xf32>
    %cst_19 = arith.constant 1.000000e+00 : f32
    %43 = vector.broadcast %cst_19 : f32 to vector<16x64xf32>
    %44 = arith.addf %43, %42 : vector<16x64xf32>
    %45 = arith.mulf %7, %44 : vector<16x64xf32>
    %c0_20 = arith.constant 0 : index
    %c0_21 = arith.constant 0 : index
    %46 = vector.load %arg5[%c0_20, %c0_21] : memref<16x64xf32, #tpu.memory_space<vmem>>, vector<16x64xf32>
    tpu.vector_store %arg5[%c0_20, %c0_21], %45 {strides = array<i32>} : memref<16x64xf32, #tpu.memory_space<vmem>>, vector<16x64xf32>,
    return
  }
  func.func @transform_0(%arg0: i32, %arg1: i32) -> (i32, i32) {
    %c0_i32 = arith.constant 0 : i32
    %c0_i32_0 = arith.constant 0 : i32
    return %arg1, %c0_i32 : i32, i32
  }
  func.func @transform_1(%arg0: i32, %arg1: i32) -> (i32, i32) {
    %c0_i32 = arith.constant 0 : i32
    %c0_i32_0 = arith.constant 0 : i32
    return %arg0, %c0_i32 : i32, i32
  }
  func.func @transform_2(%arg0: i32, %arg1: i32) -> (i32, i32) {
    %c0_i32 = arith.constant 0 : i32
    %c0_i32_0 = arith.constant 0 : i32
    return %c0_i32, %arg0 : i32, i32
  }
  func.func @transform_3(%arg0: i32, %arg1: i32) -> (i32, i32) {
    %c0_i32 = arith.constant 0 : i32
    return %arg1, %arg0 : i32, i32
  }
}

</mosaic_0001>

<bundles_post_ra>
// kernel: tpu_custom_call.1
= control target key start
LH: loop header
LB: loop body
LE: loop exit
PB: predicated region body
PF: predicated region fallthrough
CT: control target
= control target key end

     0   :  { %vm32_vm0 = vcmask 261120   ;;  %s402_s0 = inlined_call_operand.vmem [shape: f32[16,32], index: 0, kind: input, shape index: {}]   ;;  %s403_s1 = inlined_call_operand.vmem [shape: f32[64,32], index: 1, kind: input, shape index: {}]   ;;  %s404_s2 = inlined_call_operand.vmem [shape: f32[1,64], index: 2, kind: input, shape index: {}]   ;;  %s405_s3 = inlined_call_operand.hbm [shape: f32[16,64], index: 3, kind: output, shape index: {}]  }
   0x1   :  { %v17_v0 = vld [vmem:[%s403_s1] sm:$0xff]  ;;  %v18_v1 = vld [vmem:[%s403_s1 + $0x8] sm:$0xff]  ;;  %v19_v2 = vld [vmem:[%s403_s1 + $0x10] sm:$0xff] }
   0x2   :  { %v251_v3 = vpack.c.bf16 %v18_v1, %v17_v0  ;;  %vm344_vm1 = vmpackc.low %vm32_vm0, %vm32_vm0  ;;  %v20_v5 = vld [vmem:[%s403_s1 + $0x18] sm:$0xff]  ;;  %v15_v7 = vld [vmem:[%s402_s0] sm:$0xff] }
   0x3   :  { %v257_v6 = vpack.c.bf16 %v20_v5, %v19_v2 }
   0x4   :  { %253 = vmatprep.subr.msk.bf16.mxu0 %vm344_vm1, %v251_v3 }
   0x5   :  { %8 = vsyncpa [#allocation3], 0  ;;  %256 = vmatpush3.bf16.xpose.msk.msra.mxu0 %vm344_vm1, %v251_v3  ;;  %248 = vmatprep.mubr.msk.f32.mxu0 %vm32_vm0, %v15_v7  ;;  %v21_v8 = vld [vmem:[%s403_s1 + $0x20] sm:$0xff]  ;;  %v22_v9 = vld [vmem:[%s403_s1 + $0x28] sm:$0xff]  ;;  %vm192_vm4 = vcmask 523264  }
   0x6   :  { %259 = vmatprep.subr.msk.bf16.mxu0 %vm344_vm1, %v257_v6  ;;  %v263_v10 = vpack.c.bf16 %v22_v9, %v21_v8  ;;  %v23_v11 = vld [vmem:[%s403_s1 + $0x30] sm:$0xff]  ;;  %v24_v12 = vld [vmem:[%s403_s1 + $0x38] sm:$0xff]  ;;  %v16_v14 = vld [vmem:[%s402_s0 + $0x8] sm:$0xff]  ;;  %s310_s0 = smov [#allocation2]  }
   0x7   :  { %v269_v13 = vpack.c.bf16 %v24_v12, %v23_v11  ;;  %v211_v15 = vld [vmem:[%s404_s2] ss:$0 sm:$0xff]  ;;  %s200_s1 = sshll.u32 %s310_s0, 4  ;;  %s201_s1 = int_to_ptr.vmem [resolvable:$true] %s200_s1 }
   0x8   :  { %s286_s2 = scalar_lea.vmem %s201_s1, 256  ;;  %p291_p1 = scmp.lt.s32.totalorder %s201_s1, %s201_s1 }
   0x9   :  { %p287_p0 = scmp.ne.s32.totalorder %s201_s1, %s286_s2  ;;  %p292_p2 = scmp.lt.s32.totalorder %s286_s2, %s286_s2 }
   0xb   :  { %p293_p3 = por %p292_p2, %p291_p1 }
   0xd   :  { %262 = vmatpush3.bf16.xpose.msk.msra.mxu0 %vm344_vm1, %v257_v6  ;;  %p294_p4 = pnand %p293_p3, %p287_p0 }
   0xe   :  { %265 = vmatprep.subr.msk.bf16.mxu0 %vm344_vm1, %v263_v10 }
  0x15   :  { %268 = vmatpush3.bf16.xpose.msk.msra.mxu0 %vm344_vm1, %v263_v10 }
  0x16   :  { %271 = vmatprep.subr.msk.bf16.mxu0 %vm344_vm1, %v269_v13 }
  0x1d   :  { %274 = vmatpush3.bf16.xpose.msk.msra.mxu0 %vm344_vm1, %v269_v13 }
  0x24   :  { %249 = vmatmul.mubr.msk.f32.vlgmr.msra.gmra.mrb[0].mxu0 %vm32_vm0, %v16_v14 }
  0xf7   :  { %v250_v16 = vpop.f32.mrb[0].mxu0 }
  0xf8   :  { %v135_v17 = vadd.f32 %v250_v16, %v211_v15  ;;  %v129_v18 = vpop.f32.mrb[1].mxu0 }
  0xf9   :  { %v130_v19 = vadd.f32 %v211_v15, %v129_v18 }
  0xfa   :  { %v141_v20 = vmul.f32 0.70710677, %v135_v17  ;;  %v139_v63 = vmul.f32 0.5, %v135_v17 }
  0xfb   :  { %v140_v21 = vmul.f32 0.70710677, %v130_v19  ;;  %v138_v2 = vmul.f32 0.5, %v130_v19 }
  0xfc   :  { %v143_v22 = vand.u32 2147483647, %v141_v20  ;;  %vm183_vm2 = vcmp.lt.f32.partialorder %v141_v20, 0.0 }
  0xfd   :  { %v142_v23 = vand.u32 2147483647, %v140_v21  ;;  %vm182_vm3 = vcmp.lt.f32.partialorder %v140_v21, 0.0 }
  0xfe   :  { %v145_v24 = vmul.f32 0.3275911, %v143_v22  ;;  %v171_v28 = vmul.f32 %v143_v22, %v143_v22 }
  0xff   :  { %v144_v25 = vmul.f32 0.3275911, %v142_v23  ;;  %v170_v29 = vmul.f32 %v142_v23, %v142_v23 }
 0x100   :  { %v147_v26 = vadd.f32 1.0, %v145_v24  ;;  %v173_v31 = vsub.f32 0.0, %v171_v28 }
 0x101   :  { %v146_v27 = vadd.f32 1.0, %v144_v25  ;;  %v172_v34 = vsub.f32 0.0, %v170_v29 }
 0x102   :  { %278 = vrcp.f32 %v147_v26  ;;  %v176_v37 = vmul.f32 1.442695, %v173_v31 }
 0x103   :  { %280 = vrcp.f32 %v146_v27  ;;  %v174_v40 = vmul.f32 1.442695, %v172_v34 }
 0x104   :  { %282 = vpow2.f32 %v176_v37 }
 0x105   :  { %284 = vpow2.f32 %v174_v40 }
 0x10c   :  { %v279_v30 = vpop.eup %278 }
 0x10d   :  { %v281_v32 = vpop.eup %280  ;;  %v153_v33 = vmul.f32 1.0614054, %v279_v30 }
 0x10e   :  { %v152_v35 = vmul.f32 1.0614054, %v281_v32  ;;  %v283_v53 = vpop.eup %282 }
 0x10f   :  { %v155_v36 = vadd.f32 -1.4531521, %v153_v33  ;;  %v285_v55 = vpop.eup %284 }
 0x110   :  { %v154_v38 = vadd.f32 -1.4531521, %v152_v35 }
 0x111   :  { %v157_v39 = vmul.f32 %v279_v30, %v155_v36 }
 0x112   :  { %v156_v41 = vmul.f32 %v281_v32, %v154_v38 }
 0x113   :  { %v159_v42 = vadd.f32 1.4214138, %v157_v39 }
 0x114   :  { %v158_v43 = vadd.f32 1.4214138, %v156_v41 }
 0x115   :  { %v161_v44 = vmul.f32 %v279_v30, %v159_v42 }
 0x116   :  { %v160_v45 = vmul.f32 %v281_v32, %v158_v43 }
 0x117   :  { %v163_v46 = vadd.f32 -0.28449672, %v161_v44 }
 0x118   :  { %v162_v47 = vadd.f32 -0.28449672, %v160_v45 }
 0x119   :  { %v165_v48 = vmul.f32 %v279_v30, %v163_v46 }
 0x11a   :  { %v164_v49 = vmul.f32 %v281_v32, %v162_v47 }
 0x11b   :  { %v167_v50 = vadd.f32 0.2548296, %v165_v48 }
 0x11c   :  { %v166_v51 = vadd.f32 0.2548296, %v164_v49 }
 0x11d   :  { %v169_v52 = vmul.f32 %v279_v30, %v167_v50 }
 0x11e   :  { %v168_v54 = vmul.f32 %v281_v32, %v166_v51 }
 0x11f   :  { %v179_v56 = vmul.f32 %v283_v53, %v169_v52 }
 0x120   :  { %v178_v57 = vmul.f32 %v285_v55, %v168_v54 }
 0x121   :  { %v181_v58 = vsub.f32 1.0, %v179_v56 }
 0x122   :  { %v180_v59 = vsub.f32 1.0, %v178_v57 }
 0x123   :  { %v185_v60 = vsub.f32 0.0, %v181_v58 }
 0x124   :  { %v184_v61 = vsub.f32 0.0, %v180_v59 }
 0x125   :  { %v187_v62 = vsel %vm183_vm2, %v185_v60, %v181_v58 }
 0x126   :  { %v189_v0 = vadd.f32 1.0, %v187_v62  ;;  %v186_v1 = vsel %vm182_vm3, %v184_v61, %v180_v59 }
 0x127   :  { %v188_v3 = vadd.f32 1.0, %v186_v1 }
 0x128   :  { %v191_v4 = vmul.f32 %v189_v0, %v139_v63 }
 0x129   :  { %v190_v5 = vmul.f32 %v188_v3, %v138_v2 }
 0x12a   :  { %194 = vst.msk [vmem:[#allocation2 + $0x8] sm:$0xff] %vm192_vm4, %v191_v4 }
 0x12b   :  { %193 = vst.msk [vmem:[#allocation2] sm:$0xff] %vm192_vm4, %v190_v5 }
 0x12c   :  { %297 = shalt.err (!%p294_p4)
}
 0x12d   :  { %s298_s9 = scalar_lea.hbm %s405_s3, 256 }
 0x12e   :  { %p299_p5 = scmp.ne.s32.totalorder %s405_s3, %s298_s9  ;;  %p302_p6 = scmp.lt.u32.totalorder %s298_s9, %s405_s3 }
 0x130   :  { %p304_p7 = pnand %p302_p6, %p299_p5 }
 0x132   :  { %307 = shalt.err (!%p304_p7)
}
 0x133   :  { %s311_s14 = smov 128   ;;  %s312_s15 = smov 8  }
 0x134   :  { %206 = dma.vmem_to_hbm [thread:$0]  %s201_s1, 256, %s405_s3, [#allocation3], %s311_s14, %s311_s14, %s312_s15  }
 0x135   :  { %308 = dma.done.wait [#allocation3], 256  }
 0x136   :  { %309 = vsyncadd [#allocation3], 4294967040 }
 0x137   :  { %210 = vsyncpa [#allocation3], 1 }

</bundles_post_ra>
